<compile_context>
chip_gen: v7x
topology: tpu7x:2x2x1
jax: 0.10.0
libtpu: 0.0.40
codegen_flags: <defaults>
</compile_context>

<pallas_src>
import math

import jax
import jax.numpy as jnp
from jax.experimental import pallas as pl
from jax.experimental.pallas import tpu as pltpu


def _round_up(x, m):
    return ((x + m - 1) // m) * m


def _entropy_bottleneck_kernel(params_ref, z_ref, zhat_ref):
    """params_ref: (3, C) -- row 0 = exp(scaling), row 1 = 1/exp(scaling),
    row 2 = channel medians.  z_ref / zhat_ref: (block_n, C) batch tile."""
    scale = params_ref[0:1, :]       # (1, C)
    inv_scale = params_ref[1:2, :]   # (1, C)  exact f32 reciprocal of scale
    med = params_ref[2:3, :]         # (1, C)

    x = z_ref[...] * scale                     # z * scaling.exp()
    x_hat = jnp.round(x - med) + med           # quantize ("dequantize"/eval mode)
    zhat_ref[...] = x_hat * inv_scale          # z_hat / scaling.exp()
    # TODO(synk): training-mode additive U(-0.5, 0.5) noise and the
    # factorized-prior likelihood (used only by .loss()) are not implemented.


def init_params(feature_dim):
    """Parameters used by forward(): scaling = log(10) per channel, and the
    EntropyBottleneck channel medians (0 at init; pass trained medians at
    inference)."""
    return {
        "scaling": jnp.full((feature_dim,), math.log(10.0), jnp.float32),
        "medians": jnp.zeros((feature_dim,), jnp.float32),
    }


def _pick_block_n(n_rows, c_padded, target_tile_bytes=4 * 1024 * 1024):
    """Rows per tile from a byte budget: keeps double-buffered in+out tiles
    at <= ~16 MiB total (safe for v7x's 32 MiB scoped VMEM) while staying big
    enough to amortize the ~0.35 us per-grid-step overhead."""
    bytes_per_row = 4 * c_padded  # f32
    budget_rows = max(8, (target_tile_bytes // bytes_per_row) // 8 * 8)
    n_padded = _round_up(n_rows, 8)
    if budget_rows >= n_padded:
        # Whole batch fits one tile: split into >= 2 grid steps when possible
        # so the "parallel" axis can engage both v7x TensorCores.
        if n_padded >= 16:
            return _round_up(pl.cdiv(n_padded, 2), 8)
        return n_padded
    return budget_rows


def discrete_entropy_bottleneck_forward(z, params, *, block_n=None):
    """z: (N, feature_dim) float array. Returns z_hat with the same shape."""
    n, c = z.shape
    c_padded = _round_up(c, 128)   # lane-dense output: unmasked full-width stores

    # Precompute per-channel constants once in the wrapper (off the hot loop).
    scale = jnp.exp(params["scaling"]).astype(jnp.float32)
    inv_scale = 1.0 / scale        # exact reciprocal -> matches PyTorch's division
    medians = params["medians"].astype(jnp.float32)
    if c_padded != c:
        pad_c = c_padded - c
        scale = jnp.pad(scale, (0, pad_c), constant_values=1.0)
        inv_scale = jnp.pad(inv_scale, (0, pad_c), constant_values=1.0)
        medians = jnp.pad(medians, (0, pad_c), constant_values=0.0)
    packed = jnp.stack([scale, inv_scale, medians], axis=0)   # (3, c_padded)

    if block_n is None:
        block_n = _pick_block_n(n, c_padded)
    block_n = max(8, (block_n // 8) * 8)
    n_padded = _round_up(n, block_n)

    z_in = z.astype(jnp.float32)
    if (n_padded, c_padded) != (n, c):
        z_in = jnp.pad(z_in, ((0, n_padded - n), (0, c_padded - c)))

    out = pl.pallas_call(
        _entropy_bottleneck_kernel,
        out_shape=jax.ShapeDtypeStruct((n_padded, c_padded), jnp.float32),
        grid_spec=pltpu.PrefetchScalarGridSpec(
            num_scalar_prefetch=0,
            grid=(n_padded // block_n,),
            in_specs=[
                pl.BlockSpec((3, c_padded), lambda i: (0, 0)),          # params, resident
                pl.BlockSpec((block_n, c_padded), lambda i: (i, 0)),    # z tile
            ],
            out_specs=pl.BlockSpec((block_n, c_padded), lambda i: (i, 0)),
        ),
        compiler_params=pltpu.CompilerParams(
            # Independent batch rows: shard grid across v7x's 2 TCs (no-op on
            # v5e/v6e).  32 MiB explicit limit is load-bearing on v5e (16 MiB
            # default) and safe on v7x (64 MiB physical).
            dimension_semantics=("parallel",),
            vmem_limit_bytes=32 * 1024 * 1024,
        ),
    )(packed, z_in)

    if (n_padded, c_padded) != (n, c):
        out = out[:n, :c]
    return out


if __name__ == "__main__":
    key = jax.random.PRNGKey(0)

    batch, feature_dim = 16, 32            # small, non-multiple-of-128 C on purpose
    z = jax.random.normal(key, (batch, feature_dim), jnp.float32)
    params = init_params(feature_dim)

    fwd = jax.jit(discrete_entropy_bottleneck_forward)
    z_hat = fwd(z, params)
    jax.block_until_ready(z_hat)

    # Reference: identical elementwise formula in plain jnp.
    scale = jnp.exp(params["scaling"])
    inv_scale = 1.0 / scale
    med = params["medians"]
    ref = (jnp.round(z * scale - med) + med) * inv_scale

    assert z_hat.shape == (batch, feature_dim)
    assert jnp.allclose(z_hat, ref, atol=1e-6), "kernel output mismatch vs reference"
    # With default init (scaling = log 10, medians = 0): z_hat ~= round(10*z)/10.
    assert jnp.allclose(z_hat, jnp.round(z * 10.0) / 10.0, atol=1e-5)

    print("KERNEL_OK")
</pallas_src>

<mosaic_0001>
module attributes {stable_mosaic.version = 11 : i64} {
  func.func @_entropy_bottleneck_kernel(%arg0: i32, %arg1: memref<3x128xf32, #tpu.memory_space<vmem>>, %arg2: memref<8x128xf32, #tpu.memory_space<vmem>>, %arg3: memref<8x128xf32, #tpu.memory_space<vmem>>) attributes {dimension_semantics = [#tpu.dimension_semantics<parallel>], iteration_bounds = array<i64: 2>, scalar_prefetch = 0 : i64, scratch_operands = 0 : i64, tpu.core_type = #tpu.core_type<tc>, window_params = [{pipeline_mode = #tpu.pipeline_mode<synchronous>, transform_indices = @transform_0, window_bounds = array<i64: 3, 128>}, {transform_indices = @transform_1, window_bounds = array<i64: 8, 128>}, {transform_indices = @transform_2, window_bounds = array<i64: 8, 128>}]} {
    %c0 = arith.constant 0 : index
    %c0_0 = arith.constant 0 : index
    %0 = vector.load %arg1[%c0, %c0_0] : memref<3x128xf32, #tpu.memory_space<vmem>>, vector<1x128xf32>
    %c1 = arith.constant 1 : index
    %c0_1 = arith.constant 0 : index
    %1 = vector.load %arg1[%c1, %c0_1] : memref<3x128xf32, #tpu.memory_space<vmem>>, vector<1x128xf32>
    %c2 = arith.constant 2 : index
    %c0_2 = arith.constant 0 : index
    %2 = vector.load %arg1[%c2, %c0_2] : memref<3x128xf32, #tpu.memory_space<vmem>>, vector<1x128xf32>
    %c0_3 = arith.constant 0 : index
    %c0_4 = arith.constant 0 : index
    %3 = vector.load %arg2[%c0_3, %c0_4] : memref<8x128xf32, #tpu.memory_space<vmem>>, vector<8x128xf32>
    %4 = vector.broadcast %0 : vector<1x128xf32> to vector<8x128xf32>
    %5 = arith.mulf %3, %4 : vector<8x128xf32>
    %6 = vector.broadcast %2 : vector<1x128xf32> to vector<8x128xf32>
    %7 = arith.subf %5, %6 : vector<8x128xf32>
    %8 = math.roundeven %7 : vector<8x128xf32>
    %9 = vector.broadcast %2 : vector<1x128xf32> to vector<8x128xf32>
    %10 = arith.addf %8, %9 : vector<8x128xf32>
    %11 = vector.broadcast %1 : vector<1x128xf32> to vector<8x128xf32>
    %12 = arith.mulf %10, %11 : vector<8x128xf32>
    %c0_5 = arith.constant 0 : index
    %c0_6 = arith.constant 0 : index
    %13 = vector.load %arg3[%c0_5, %c0_6] : memref<8x128xf32, #tpu.memory_space<vmem>>, vector<8x128xf32>
    tpu.vector_store %arg3[%c0_5, %c0_6], %12 {strides = array<i32>} : memref<8x128xf32, #tpu.memory_space<vmem>>, vector<8x128xf32>,
    return
  }
  func.func @transform_0(%arg0: i32) -> (i32, i32) {
    %c0_i32 = arith.constant 0 : i32
    %c0_i32_0 = arith.constant 0 : i32
    %c0_i32_1 = arith.constant 0 : i32
    return %c0_i32, %c0_i32_0 : i32, i32
  }
  func.func @transform_1(%arg0: i32) -> (i32, i32) {
    %c0_i32 = arith.constant 0 : i32
    %c0_i32_0 = arith.constant 0 : i32
    return %arg0, %c0_i32 : i32, i32
  }
  func.func @transform_2(%arg0: i32) -> (i32, i32) {
    %c0_i32 = arith.constant 0 : i32
    %c0_i32_0 = arith.constant 0 : i32
    return %arg0, %c0_i32 : i32, i32
  }
}

</mosaic_0001>

<bundles_post_ra>
// kernel: discrete_entropy_bottleneck_forward.1
= control target key start
LH: loop header
LB: loop body
LE: loop exit
PB: predicated region body
PF: predicated region fallthrough
CT: control target
= control target key end

     0   :  { %7 = vsyncpa [#allocation3], 0  ;;  %s476_s0 = inlined_call_operand.vmem [shape: f32[3,128], index: 0, kind: input, shape index: {}]   ;;  %s477_s1 = inlined_call_operand.vmem [shape: f32[16,128], index: 1, kind: input, shape index: {}]   ;;  %s478_s2 = inlined_call_operand.hbm [shape: f32[16,128], index: 2, kind: output, shape index: {}]  }
   0x1   :  { %9 = vsyncpa [#allocation3 + $0x1], 0  ;;  %s367_s9 = smov 0   ;;  %s369_s10 = smov 0  }
   0x2   :  { %s371_s11 = smov 0   ;;  %s373_s12 = smov 0  }
   0x3 LB: > { %s388_s13 = sadd.s32 4294967295, %s349_s12   ;;  %s234_s14 = sadd.s32 4294967294, %s349_s12   ;;  %s349_s12 = sphi %s373_s12, %s484_s12   ;;  %s345_s11 = sphi %s371_s11, %s483_s11   ;;  %s341_s10 = sphi %s369_s10, %s482_s10   ;;  %s337_s9 = sphi %s367_s9, %s481_s9  }
   0x4   : > { %s392_s15 = sadd.s32 1, %s349_s12   ;;  %s69_s16 = sadd.s32 1, %s345_s11 }
   0x5   : > { %s66_s17 = ssub.s32 %s349_s12, %s392_s15  ;;  %p79_p0 = scmp.ne.s32.totalorder %s345_s11, %s341_s10 }
   0x6   : > { %p67_p1 = scmp.eq.s32.totalorder %s66_s17, 0  ;;  %p80_p2 = scmp.eq.s32.totalorder %s388_s13, 1 }
   0x7   : > { %p85_p3 = scmp.ne.s32.totalorder %s341_s10, %s337_s9  ;;  %p86_p4 = scmp.eq.s32.totalorder %s234_s14, 1 }
   0x8   : > { %s403_s18 = scalar_select %p67_p1, %s345_s11, %s69_s16  }
   0x9   : > { %p405_p5 = por %p80_p2, %p79_p0  ;;  %p409_p6 = por %p86_p4, %p85_p3 }
   0xa   : > { %p237_p7 = scmp.ge.s32.totalorder %s349_s12, 1  ;;  %p114_p8 = scmp.lt.s32.totalorder %s349_s12, 3 }
   0xc   : > { %p115_p9 = pnand %p237_p7, %p114_p8 }
   0xd   : > { %p135_p10 = scmp.lt.s32.totalorder (!%p115_p9), %s388_s13, 1  ;;  %s132_s22 = sand.u32 (!%p115_p9), 1, %s341_s10   ;;  %v240_v0 = vld [vmem:[%s476_s0] ss:$0 sm:$0xff] (!%p115_p9)  ;;  %v241_v1 = vld [vmem:[%s476_s0 + $0x2] ss:$0 sm:$0xff] (!%p115_p9) }
   0xe   : > { %118 = sbr.rel (%p115_p9) target bundleno = 50 (0x32), region = 28  ;;  %s238_s29 = sshll.u32 (!%p115_p9), %s132_s22, 3  ;;  %v242_v6 = vld [vmem:[%s476_s0 + $0x1] ss:$0 sm:$0xff] (!%p115_p9) }
   0xf   : > { %s134_s6 = scalar_lea.vmem (!%p115_p9), [#allocation2], %s238_s29  ;;  %s244_s8 = sshll.u32 (!%p115_p9), %s388_s13, 7 }
  0x10   : > { %s175_s7 = sshll.u32 (!%p115_p9), %s134_s6, 4  ;;  %s436_s17 = scalar_lea.hbm (!%p115_p9), %s478_s2, %s244_s8  ;;  %s431_s7 = int_to_ptr.vmem [resolvable:$true] %s175_s7 }
  0x15   : > { %s136_s21 = scalar_select %p135_p10, %s388_s13, 1 }
  0x16   : > { %s351_s13 = smov [#allocation2]  }
  0x17   : > { %s239_s23 = sshll.u32 %s136_s21, 3  ;;  %s162_s21 = scalar_lea.sflag [#allocation3], %s132_s22 }
  0x18   : > { %s138_s28 = scalar_lea.vmem %s477_s1, %s239_s23  ;;  %s287_s23 = scalar_lea.vmem %s431_s7, 128 }
  0x19   : > { %v142_v2 = vld [vmem:[%s138_s28] sm:$0xff]  ;;  %p288_p11 = scmp.ne.s32.totalorder %s431_s7, %s287_s23  ;;  %s291_s24 = sshll.u32 %s351_s13, 4  ;;  %s292_s24 = int_to_ptr.vmem [resolvable:$false] %s291_s24 }
  0x1a   : > { %v147_v3 = vmul.f32 %v240_v0, %v142_v2  ;;  %s293_s25 = scalar_lea.vmem %s292_s24, 256  ;;  %p294_p0 = scmp.lt.s32.totalorder %s431_s7, %s292_s24 }
  0x1b   : > { %p289_p12 = pnand %p288_p11, %p405_p5  ;;  %p295_p1 = scmp.lt.s32.totalorder %s293_s25, %s287_s23 }
  0x1c   : > { %v152_v4 = vsub.f32 %v147_v3, %v241_v1 }
  0x1d   : > { %p290_p13 = pneg %p289_p12  ;;  %p296_p2 = por %p295_p1, %p294_p0 }
  0x1e   : > { %v247_v5 = vround.rtne.f32 %v152_v4 }
  0x1f   : > { %p297_p3 = pnand %p296_p2, %p290_p13 }
  0x20   : > { %v154_v7 = vadd.f32 %v247_v5, %v241_v1 }
  0x22   : > { %v159_v8 = vmul.f32 %v242_v6, %v154_v7 }
  0x24   : > { %160 = vst [vmem:[%s134_s6] sm:$0xff] %v159_v8 }
  0x25   : > { %300 = shalt.err (!%p297_p3)
}
  0x26   : > { %s301_s22 = scalar_lea.hbm %s436_s17, 128  ;;  %s305_s28 = scalar_lea.hbm %s478_s2, 256 }
  0x27   : > { %p302_p4 = scmp.ne.s32.totalorder %s436_s17, %s301_s22  ;;  %p306_p9 = scmp.lt.u32.totalorder %s436_s17, %s478_s2 }
  0x28   : > { %p307_p10 = scmp.lt.u32.totalorder %s305_s28, %s301_s22  ;;  %p309_p12 = scmp.lt.u32.totalorder %s301_s22, %s436_s17 }
  0x29   : > { %p303_p7 = pnand %p302_p4, %p405_p5 }
  0x2a   : > { %p308_p11 = por %p307_p10, %p306_p9 }
  0x2b   : > { %p304_p8 = pneg %p303_p7 }
  0x2c   : > { %p310_p13 = por %p309_p12, %p308_p11 }
  0x2e   : > { %p311_p0 = pnand %p310_p13, %p304_p8 }
  0x30   : > { %314 = shalt.err (!%p311_p0)
}
  0x31   : > { %248 = dma.vmem_to_hbm [thread:$0]  (%p405_p5), %s431_s7, 128, %s436_s17, %s162_s21  }
  0x32 PF: > { %p254_p1 = scmp.ge.s32.totalorder %s349_s12, 2  ;;  %s187_s3 = sand.u32 1, %s337_s9  }
  0x33   : > { %s188_s4 = scalar_lea.sflag [#allocation3], %s187_s3 }
  0x34   : > { %p251_p2 = pnand %p254_p1, %p409_p6 }
  0x36   : > { %332 = dma.done.wait (!%p251_p2), %s188_s4, 128  }
  0x37   : > { %334 = vsyncadd (!%p251_p2), %s188_s4, 4294967168  ;;  %p12_p3 = scmp.ge.s32.totalorder %s392_s15, 4   ;;  %s481_s9 = smov %s341_s10 }
  0x38   : > { %s482_s10 = smov %s345_s11  ;;  %s483_s11 = smov %s403_s18 }
  0x39   : > { %s484_s12 = smov %s392_s15  ;;  %14 = sbr.rel (!%p12_p3) target bundleno = 3 (0x3), region = 63 }
  0x40   :  { %193 = vsyncpa [#allocation3], 1 }
  0x41   :  { %195 = vsyncpa [#allocation3 + $0x1], 1 }

</bundles_post_ra>
